<compile_context>
chip_gen: v7x
topology: tpu7x:2x2x1
jax: 0.10.0
libtpu: 0.0.40
codegen_flags: <defaults>
</compile_context>

<pallas_src>
import functools

import jax
import jax.numpy as jnp
from jax.experimental import pallas as pl
from jax.experimental.pallas import tpu as pltpu

_LANES = 128
_ACC_ROWS = 8


def _min_sublanes(dtype):
    # Minimum packed sublane tile: f32 -> 8, bf16 -> 16, int8/uint8/bool -> 32.
    return max(8, 32 // jnp.dtype(dtype).itemsize)


def _fold_rows(v):
    """Reduce (rows, 128) f32 -> (8, 128) using only VPU adds (no cross-lane work)."""
    rows = v.shape[0]
    nfull = (rows // _ACC_ROWS) * _ACC_ROWS
    acc = None
    if nfull:
        blk = v if nfull == rows else v[:nfull]
        if nfull == _ACC_ROWS:
            acc = blk
        else:
            acc = jnp.sum(blk.reshape(nfull // _ACC_ROWS, _ACC_ROWS, _LANES), axis=0)
    rem = rows - nfull
    if rem:
        tail = jnp.sum(v[nfull:], axis=0, keepdims=True)                  # (1, 128)
        row0 = jax.lax.broadcasted_iota(jnp.int32, (_ACC_ROWS, _LANES), 0) == 0
        tail = jnp.where(row0, tail, 0.0)                                  # (8, 128)
        acc = tail if acc is None else acc + tail
    return acc


def _dice_sums_kernel(x_ref, t_ref, m_ref, a_ref, b_ref, c_ref,
                      a_acc, b_acc, c_acc, *, r_total, tail_mask):
    """Grid = (B', K).  Each step reduces one (tr, 128) row tile of one batch row.

    (8, 128) f32 accumulators persist across the reduction axis k:
      a = sum(x*m * t*m), b = sum((x*m)^2), c = sum((t*m)^2)
    The per-batch scalar sums are written on the last k step.
    """
    k = pl.program_id(1)
    nk = pl.num_programs(1)

    @pl.when(k == 0)
    def _init():
        a_acc[...] = jnp.zeros_like(a_acc)
        b_acc[...] = jnp.zeros_like(b_acc)
        c_acc[...] = jnp.zeros_like(c_acc)

    def _accumulate(mask_oob_rows):
        x = jax.nn.sigmoid(x_ref[...].astype(jnp.float32))
        t = t_ref[...].astype(jnp.float32)
        m = m_ref[...].astype(jnp.float32)
        xm = x * m
        tm = t * m
        if mask_oob_rows:
            # Partial last row tile: zero out-of-bounds rows (partial-block
            # reads are not zeroed by Pallas).  Mask after the multiply so
            # stale NaN/Inf in uninitialized VMEM cannot poison the sums.
            tr = xm.shape[0]
            rows = jax.lax.broadcasted_iota(jnp.int32, (tr, _LANES), 0) + k * tr
            valid = rows < r_total
            xm = jnp.where(valid, xm, 0.0)
            tm = jnp.where(valid, tm, 0.0)
        a_acc[...] += _fold_rows(xm * tm)
        b_acc[...] += _fold_rows(xm * xm)
        c_acc[...] += _fold_rows(tm * tm)

    if tail_mask:
        # Fast (unmasked) path for all full tiles; mask only the last tile.
        @pl.when(k != nk - 1)
        def _fast():
            _accumulate(False)

        @pl.when(k == nk - 1)
        def _last():
            _accumulate(True)
    else:
        _accumulate(False)

    @pl.when(k == nk - 1)
    def _finalize():
        def _scalar11(v):                              # (8, 128) -> (1, 1)
            s = jnp.sum(v, axis=1, keepdims=True)      # lane reduce (XLU)
            return jnp.sum(s, axis=0, keepdims=True)   # sublane reduce
        a_ref[0] = _scalar11(a_acc[...])
        b_ref[0] = _scalar11(b_acc[...])
        c_ref[0] = _scalar11(c_acc[...])


def _pick_tile(r, cap, align):
    """Pick row tile: full extent, a divisor of r (no masking), or masked tail."""
    if r <= cap:
        return r, False
    cap = max((cap // align) * align, align)
    for tr in range(cap, 0, -align):
        if r % tr == 0:
            return tr, False
    return cap, True


def _dice_sums_pallas(x3, t3, m3, r, tile_rows):
    """x3/t3/m3: (B', r, 128).  Returns per-row sums (a, b, c), each (B',) f32."""
    bb = x3.shape[0]
    align = max(_min_sublanes(a.dtype) for a in (x3, t3, m3))
    bytes_per_row = _LANES * sum(a.dtype.itemsize for a in (x3, t3, m3))
    # Keep the three double-buffered input tiles within ~40 MiB (v7x-safe).
    rows_cap = max(align, ((40 << 20) // (2 * bytes_per_row)) // align * align)
    cap = max(min(int(tile_rows), rows_cap), align)
    tr, tail_mask = _pick_tile(r, cap, align)
    k_steps = pl.cdiv(r, tr)

    tile_bytes = 2 * tr * bytes_per_row                     # 3 inputs, 2 buffers
    vmem_limit = int(min(max(32 << 20, tile_bytes + (8 << 20)), 48 << 20))

    n_elems = bb * r * _LANES
    cost = pl.CostEstimate(
        flops=8 * n_elems,
        transcendentals=n_elems,  # sigmoid
        bytes_accessed=sum(a.size * a.dtype.itemsize for a in (x3, t3, m3)) + 12 * bb,
    )

    out_sd = jax.ShapeDtypeStruct((bb, 1, 1), jnp.float32)
    in_spec = pl.BlockSpec((None, tr, _LANES), lambda bi, ki: (bi, ki, 0))
    out_spec = pl.BlockSpec((1, 1, 1), lambda bi, ki: (bi, 0, 0))

    a_out, b_out, c_out = pl.pallas_call(
        functools.partial(_dice_sums_kernel, r_total=r, tail_mask=tail_mask),
        out_shape=(out_sd, out_sd, out_sd),
        grid_spec=pltpu.PrefetchScalarGridSpec(
            num_scalar_prefetch=0,
            grid=(bb, k_steps),
            in_specs=[in_spec, in_spec, in_spec],
            out_specs=[out_spec, out_spec, out_spec],
            scratch_shapes=[pltpu.VMEM((_ACC_ROWS, _LANES), jnp.float32)] * 3,
        ),
        compiler_params=pltpu.CompilerParams(
            dimension_semantics=("parallel", "arbitrary"),
            vmem_limit_bytes=vmem_limit,
        ),
        cost_estimate=cost,
    )(x3, t3, m3)
    return a_out[:, 0, 0], b_out[:, 0, 0], c_out[:, 0, 0]


@functools.partial(jax.jit, static_argnames=("loss_weight", "reduce", "tile_rows"))
def dice_loss(inp, target, mask, *, loss_weight=1.0, reduce=True, tile_rows=4096):
    b = inp.shape[0]
    x2 = inp.reshape(b, -1)
    t2 = target.reshape(b, -1)
    m2 = mask.reshape(b, -1)
    n = x2.shape[1]
    n_full = (n // _LANES) * _LANES

    # <128-element column tail: tiny XLA reduction on the unpadded data
    # instead of a full-tensor jnp.pad of x, t, m.
    if n_full != n:
        xt = jax.nn.sigmoid(x2[:, n_full:].astype(jnp.float32))
        tt = t2[:, n_full:].astype(jnp.float32)
        mt = m2[:, n_full:].astype(jnp.float32)
        xmt = xt * mt
        tmt = tt * mt
        a_sum = jnp.sum(xmt * tmt, axis=1)
        b_sum = jnp.sum(xmt * xmt, axis=1)
        c_sum = jnp.sum(tmt * tmt, axis=1)
    else:
        a_sum = b_sum = c_sum = jnp.zeros((b,), jnp.float32)

    if n_full > 0:
        r = n_full // _LANES
        # TODO(synk): when N % 128 != 0 the prefix slice below still
        # materializes one copy of the bulk; a zero-copy path would need a
        # flat-layout kernel.
        xk = x2 if n_full == n else x2[:, :n_full]
        tk = t2 if n_full == n else t2[:, :n_full]
        mk = m2 if n_full == n else m2[:, :n_full]

        # B == 1: split each row into two pseudo-batches so the "parallel"
        # grid axis can feed both v7x TensorCores (harmless on 1-TC chips).
        split = 2 if (b == 1 and r % 2 == 0 and r >= 16) else 1
        rk = r // split
        x3 = xk.reshape(b * split, rk, _LANES)
        t3 = tk.reshape(b * split, rk, _LANES)
        m3 = mk.reshape(b * split, rk, _LANES)

        a_k, b_k, c_k = _dice_sums_pallas(x3, t3, m3, rk, tile_rows)
        if split > 1:
            a_k = a_k.reshape(b, split).sum(axis=1)
            b_k = b_k.reshape(b, split).sum(axis=1)
            c_k = c_k.reshape(b, split).sum(axis=1)
        a_sum = a_sum + a_k
        b_sum = b_sum + b_k
        c_sum = c_sum + c_k

    bb_ = b_sum + 0.001
    cc_ = c_sum + 0.001
    loss = loss_weight * (1.0 - 2.0 * a_sum / (bb_ + cc_))
    if reduce:
        loss = jnp.mean(loss)
    return loss


def _dice_loss_ref(inp, target, mask, *, loss_weight=1.0, reduce=True):
    b = inp.shape[0]
    x = jax.nn.sigmoid(inp.astype(jnp.float32)).reshape(b, -1)
    t = target.reshape(b, -1).astype(jnp.float32)
    m = mask.reshape(b, -1).astype(jnp.float32)
    x = x * m
    t = t * m
    a = jnp.sum(x * t, axis=1)
    bb = jnp.sum(x * x, axis=1) + 0.001
    cc = jnp.sum(t * t, axis=1) + 0.001
    loss = loss_weight * (1.0 - 2.0 * a / (bb + cc))
    return jnp.mean(loss) if reduce else loss


if __name__ == "__main__":
    key = jax.random.PRNGKey(0)
    k1, k2, k3, k4, k5, k6, k7, k8, k9 = jax.random.split(key, 9)

    # Case 1: N % 128 == 0 (free lane-dense view), f32 target/mask, reduce=True.
    B, C, H, W = 2, 4, 16, 16
    inp = jax.random.normal(k1, (B, C, H, W), dtype=jnp.float32)
    target = (jax.random.uniform(k2, (B, C, H, W)) > 0.5).astype(jnp.float32)
    mask = (jax.random.uniform(k3, (B, C, H, W)) > 0.2).astype(jnp.float32)
    out = jax.block_until_ready(dice_loss(inp, target, mask))
    ref = _dice_loss_ref(inp, target, mask)
    assert jnp.allclose(out, ref, atol=1e-5, rtol=1e-5), (out, ref)

    # Case 2: ragged N (not a multiple of 128) handled via the XLA column-tail
    # path, bf16 target/mask passed straight through (kernel upcasts), reduce=False.
    B2, C2, H2, W2 = 2, 3, 20, 24
    inp2 = jax.random.normal(k4, (B2, C2, H2, W2), dtype=jnp.float32)
    target2 = (jax.random.uniform(k5, (B2, C2, H2, W2)) > 0.5).astype(jnp.bfloat16)
    mask2 = (jax.random.uniform(k6, (B2, C2, H2, W2)) > 0.2).astype(jnp.bfloat16)
    out2 = jax.block_until_ready(
        dice_loss(inp2, target2, mask2, loss_weight=0.5, reduce=False))
    ref2 = _dice_loss_ref(inp2, target2, mask2, loss_weight=0.5, reduce=False)
    assert jnp.allclose(out2, ref2, atol=1e-5, rtol=1e-5), (out2, ref2)

    # Case 3: B == 1 (pseudo-batch split for the 2-TC case) with a multi-step
    # reduction and a masked partial last tile (tile_rows=48 does not divide R).
    B3, C3, H3, W3 = 1, 1, 160, 160
    inp3 = jax.random.normal(k7, (B3, C3, H3, W3), dtype=jnp.float32)
    target3 = (jax.random.uniform(k8, (B3, C3, H3, W3)) > 0.5).astype(jnp.float32)
    mask3 = (jax.random.uniform(k9, (B3, C3, H3, W3)) > 0.2).astype(jnp.float32)
    out3 = jax.block_until_ready(dice_loss(inp3, target3, mask3, tile_rows=48))
    ref3 = _dice_loss_ref(inp3, target3, mask3)
    assert jnp.allclose(out3, ref3, atol=1e-5, rtol=1e-5), (out3, ref3)

    print("KERNEL_OK")
</pallas_src>

<mosaic_0001>
module attributes {stable_mosaic.version = 11 : i64} {
  func.func @_dice_sums_kernel(%arg0: i32, %arg1: i32, %arg2: memref<1x8x128xf32, #tpu.memory_space<vmem>>, %arg3: memref<1x8x128xf32, #tpu.memory_space<vmem>>, %arg4: memref<1x8x128xf32, #tpu.memory_space<vmem>>, %arg5: memref<1x1x1xf32, #tpu.memory_space<vmem>>, %arg6: memref<1x1x1xf32, #tpu.memory_space<vmem>>, %arg7: memref<1x1x1xf32, #tpu.memory_space<vmem>>, %arg8: memref<8x128xf32, #tpu.memory_space<vmem>>, %arg9: memref<8x128xf32, #tpu.memory_space<vmem>>, %arg10: memref<8x128xf32, #tpu.memory_space<vmem>>) attributes {dimension_semantics = [#tpu.dimension_semantics<parallel>, #tpu.dimension_semantics<arbitrary>], iteration_bounds = array<i64: 2, 1>, scalar_prefetch = 0 : i64, scratch_operands = 3 : i64, tpu.core_type = #tpu.core_type<tc>, window_params = [{transform_indices = @transform_0, window_bounds = array<i64: 1, 8, 128>}, {transform_indices = @transform_1, window_bounds = array<i64: 1, 8, 128>}, {transform_indices = @transform_2, window_bounds = array<i64: 1, 8, 128>}, {transform_indices = @transform_3, window_bounds = array<i64: 1, 1, 1>}, {transform_indices = @transform_4, window_bounds = array<i64: 1, 1, 1>}, {transform_indices = @transform_5, window_bounds = array<i64: 1, 1, 1>}]} {
    %c0_i32 = arith.constant 0 : i32
    %0 = arith.cmpi eq, %arg1, %c0_i32 : i32
    %1 = arith.extui %0 : i1 to i32
    %c0_i32_0 = arith.constant 0 : i32
    %2 = arith.cmpi ne, %1, %c0_i32_0 : i32
    scf.if %2 {
      %cst_23 = arith.constant 0.000000e+00 : f32
      %31 = vector.broadcast %cst_23 : f32 to vector<8x128xf32>
      %c0_24 = arith.constant 0 : index
      %c0_25 = arith.constant 0 : index
      %32 = vector.load %arg8[%c0_24, %c0_25] : memref<8x128xf32, #tpu.memory_space<vmem>>, vector<8x128xf32>
      tpu.vector_store %arg8[%c0_24, %c0_25], %31 {strides = array<i32>} : memref<8x128xf32, #tpu.memory_space<vmem>>, vector<8x128xf32>,
      %cst_26 = arith.constant 0.000000e+00 : f32
      %33 = vector.broadcast %cst_26 : f32 to vector<8x128xf32>
      %c0_27 = arith.constant 0 : index
      %c0_28 = arith.constant 0 : index
      %34 = vector.load %arg9[%c0_27, %c0_28] : memref<8x128xf32, #tpu.memory_space<vmem>>, vector<8x128xf32>
      tpu.vector_store %arg9[%c0_27, %c0_28], %33 {strides = array<i32>} : memref<8x128xf32, #tpu.memory_space<vmem>>, vector<8x128xf32>,
      %cst_29 = arith.constant 0.000000e+00 : f32
      %35 = vector.broadcast %cst_29 : f32 to vector<8x128xf32>
      %c0_30 = arith.constant 0 : index
      %c0_31 = arith.constant 0 : index
      %36 = vector.load %arg10[%c0_30, %c0_31] : memref<8x128xf32, #tpu.memory_space<vmem>>, vector<8x128xf32>
      tpu.vector_store %arg10[%c0_30, %c0_31], %35 {strides = array<i32>} : memref<8x128xf32, #tpu.memory_space<vmem>>, vector<8x128xf32>,
    } else {
    }
    %c0 = arith.constant 0 : index
    %c0_1 = arith.constant 0 : index
    %c0_2 = arith.constant 0 : index
    %3 = vector.load %arg2[%c0, %c0_1, %c0_2] : memref<1x8x128xf32, #tpu.memory_space<vmem>>, vector<1x8x128xf32>
    %4 = vector.shape_cast %3 : vector<1x8x128xf32> to vector<8x128xf32>
    %5 = arith.negf %4 : vector<8x128xf32>
    %6 = math.exp %5 : vector<8x128xf32>
    %cst = arith.constant 1.000000e+00 : f32
    %7 = vector.broadcast %cst : f32 to vector<8x128xf32>
    %8 = arith.addf %7, %6 : vector<8x128xf32>
    %9 = arith.divf %7, %8 : vector<8x128xf32>
    %c0_3 = arith.constant 0 : index
    %c0_4 = arith.constant 0 : index
    %c0_5 = arith.constant 0 : index
    %10 = vector.load %arg3[%c0_3, %c0_4, %c0_5] : memref<1x8x128xf32, #tpu.memory_space<vmem>>, vector<1x8x128xf32>
    %11 = vector.shape_cast %10 : vector<1x8x128xf32> to vector<8x128xf32>
    %c0_6 = arith.constant 0 : index
    %c0_7 = arith.constant 0 : index
    %c0_8 = arith.constant 0 : index
    %12 = vector.load %arg4[%c0_6, %c0_7, %c0_8] : memref<1x8x128xf32, #tpu.memory_space<vmem>>, vector<1x8x128xf32>
    %13 = vector.shape_cast %12 : vector<1x8x128xf32> to vector<8x128xf32>
    %14 = arith.mulf %9, %13 : vector<8x128xf32>
    %15 = arith.mulf %11, %13 : vector<8x128xf32>
    %c0_9 = arith.constant 0 : index
    %c0_10 = arith.constant 0 : index
    %16 = vector.load %arg8[%c0_9, %c0_10] : memref<8x128xf32, #tpu.memory_space<vmem>>, vector<8x128xf32>
    %17 = arith.mulf %14, %15 : vector<8x128xf32>
    %18 = arith.addf %16, %17 : vector<8x128xf32>
    %c0_11 = arith.constant 0 : index
    %c0_12 = arith.constant 0 : index
    %19 = vector.load %arg8[%c0_11, %c0_12] : memref<8x128xf32, #tpu.memory_space<vmem>>, vector<8x128xf32>
    tpu.vector_store %arg8[%c0_11, %c0_12], %18 {strides = array<i32>} : memref<8x128xf32, #tpu.memory_space<vmem>>, vector<8x128xf32>,
    %c0_13 = arith.constant 0 : index
    %c0_14 = arith.constant 0 : index
    %20 = vector.load %arg9[%c0_13, %c0_14] : memref<8x128xf32, #tpu.memory_space<vmem>>, vector<8x128xf32>
    %21 = arith.mulf %14, %14 : vector<8x128xf32>
    %22 = arith.addf %20, %21 : vector<8x128xf32>
    %c0_15 = arith.constant 0 : index
    %c0_16 = arith.constant 0 : index
    %23 = vector.load %arg9[%c0_15, %c0_16] : memref<8x128xf32, #tpu.memory_space<vmem>>, vector<8x128xf32>
    tpu.vector_store %arg9[%c0_15, %c0_16], %22 {strides = array<i32>} : memref<8x128xf32, #tpu.memory_space<vmem>>, vector<8x128xf32>,
    %c0_17 = arith.constant 0 : index
    %c0_18 = arith.constant 0 : index
    %24 = vector.load %arg10[%c0_17, %c0_18] : memref<8x128xf32, #tpu.memory_space<vmem>>, vector<8x128xf32>
    %25 = arith.mulf %15, %15 : vector<8x128xf32>
    %26 = arith.addf %24, %25 : vector<8x128xf32>
    %c0_19 = arith.constant 0 : index
    %c0_20 = arith.constant 0 : index
    %27 = vector.load %arg10[%c0_19, %c0_20] : memref<8x128xf32, #tpu.memory_space<vmem>>, vector<8x128xf32>
    tpu.vector_store %arg10[%c0_19, %c0_20], %26 {strides = array<i32>} : memref<8x128xf32, #tpu.memory_space<vmem>>, vector<8x128xf32>,
    %c0_i32_21 = arith.constant 0 : i32
    %28 = arith.cmpi eq, %arg1, %c0_i32_21 : i32
    %29 = arith.extui %28 : i1 to i32
    %c0_i32_22 = arith.constant 0 : i32
    %30 = arith.cmpi ne, %29, %c0_i32_22 : i32
    scf.if %30 {
      %c0_23 = arith.constant 0 : index
      %c0_24 = arith.constant 0 : index
      %31 = vector.load %arg8[%c0_23, %c0_24] : memref<8x128xf32, #tpu.memory_space<vmem>>, vector<8x128xf32>
      %cst_25 = arith.constant dense<0.000000e+00> : vector<8xf32>
      %32 = vector.multi_reduction <add>, %31, %cst_25 [1] : vector<8x128xf32> to vector<8xf32>
      %33 = vector.shape_cast %32 : vector<8xf32> to vector<8x1xf32>
      %cst_26 = arith.constant dense<0.000000e+00> : vector<1xf32>
      %34 = vector.multi_reduction <add>, %33, %cst_26 [0] : vector<8x1xf32> to vector<1xf32>
      %35 = vector.shape_cast %34 : vector<1xf32> to vector<1x1xf32>
      %c0_27 = arith.constant 0 : index
      %c0_28 = arith.constant 0 : index
      %c0_29 = arith.constant 0 : index
      %36 = vector.load %arg5[%c0_27, %c0_28, %c0_29] : memref<1x1x1xf32, #tpu.memory_space<vmem>>, vector<1x1x1xf32>
      %37 = vector.shape_cast %36 : vector<1x1x1xf32> to vector<1x1xf32>
      %38 = vector.shape_cast %35 : vector<1x1xf32> to vector<1x1x1xf32>
      tpu.vector_store %arg5[%c0_27, %c0_28, %c0_29], %38 {strides = array<i32>} : memref<1x1x1xf32, #tpu.memory_space<vmem>>, vector<1x1x1xf32>,
      %c0_30 = arith.constant 0 : index
      %c0_31 = arith.constant 0 : index
      %39 = vector.load %arg9[%c0_30, %c0_31] : memref<8x128xf32, #tpu.memory_space<vmem>>, vector<8x128xf32>
      %cst_32 = arith.constant dense<0.000000e+00> : vector<8xf32>
      %40 = vector.multi_reduction <add>, %39, %cst_32 [1] : vector<8x128xf32> to vector<8xf32>
      %41 = vector.shape_cast %40 : vector<8xf32> to vector<8x1xf32>
      %cst_33 = arith.constant dense<0.000000e+00> : vector<1xf32>
      %42 = vector.multi_reduction <add>, %41, %cst_33 [0] : vector<8x1xf32> to vector<1xf32>
      %43 = vector.shape_cast %42 : vector<1xf32> to vector<1x1xf32>
      %c0_34 = arith.constant 0 : index
      %c0_35 = arith.constant 0 : index
      %c0_36 = arith.constant 0 : index
      %44 = vector.load %arg6[%c0_34, %c0_35, %c0_36] : memref<1x1x1xf32, #tpu.memory_space<vmem>>, vector<1x1x1xf32>
      %45 = vector.shape_cast %44 : vector<1x1x1xf32> to vector<1x1xf32>
      %46 = vector.shape_cast %43 : vector<1x1xf32> to vector<1x1x1xf32>
      tpu.vector_store %arg6[%c0_34, %c0_35, %c0_36], %46 {strides = array<i32>} : memref<1x1x1xf32, #tpu.memory_space<vmem>>, vector<1x1x1xf32>,
      %c0_37 = arith.constant 0 : index
      %c0_38 = arith.constant 0 : index
      %47 = vector.load %arg10[%c0_37, %c0_38] : memref<8x128xf32, #tpu.memory_space<vmem>>, vector<8x128xf32>
      %cst_39 = arith.constant dense<0.000000e+00> : vector<8xf32>
      %48 = vector.multi_reduction <add>, %47, %cst_39 [1] : vector<8x128xf32> to vector<8xf32>
      %49 = vector.shape_cast %48 : vector<8xf32> to vector<8x1xf32>
      %cst_40 = arith.constant dense<0.000000e+00> : vector<1xf32>
      %50 = vector.multi_reduction <add>, %49, %cst_40 [0] : vector<8x1xf32> to vector<1xf32>
      %51 = vector.shape_cast %50 : vector<1xf32> to vector<1x1xf32>
      %c0_41 = arith.constant 0 : index
      %c0_42 = arith.constant 0 : index
      %c0_43 = arith.constant 0 : index
      %52 = vector.load %arg7[%c0_41, %c0_42, %c0_43] : memref<1x1x1xf32, #tpu.memory_space<vmem>>, vector<1x1x1xf32>
      %53 = vector.shape_cast %52 : vector<1x1x1xf32> to vector<1x1xf32>
      %54 = vector.shape_cast %51 : vector<1x1xf32> to vector<1x1x1xf32>
      tpu.vector_store %arg7[%c0_41, %c0_42, %c0_43], %54 {strides = array<i32>} : memref<1x1x1xf32, #tpu.memory_space<vmem>>, vector<1x1x1xf32>,
    } else {
    }
    return
  }
  func.func @transform_0(%arg0: i32, %arg1: i32) -> (i32, i32, i32) {
    %c0_i32 = arith.constant 0 : i32
    %c0_i32_0 = arith.constant 0 : i32
    return %arg0, %arg1, %c0_i32 : i32, i32, i32
  }
  func.func @transform_1(%arg0: i32, %arg1: i32) -> (i32, i32, i32) {
    %c0_i32 = arith.constant 0 : i32
    %c0_i32_0 = arith.constant 0 : i32
    return %arg0, %arg1, %c0_i32 : i32, i32, i32
  }
  func.func @transform_2(%arg0: i32, %arg1: i32) -> (i32, i32, i32) {
    %c0_i32 = arith.constant 0 : i32
    %c0_i32_0 = arith.constant 0 : i32
    return %arg0, %arg1, %c0_i32 : i32, i32, i32
  }
  func.func @transform_3(%arg0: i32, %arg1: i32) -> (i32, i32, i32) {
    %c0_i32 = arith.constant 0 : i32
    %c0_i32_0 = arith.constant 0 : i32
    %c0_i32_1 = arith.constant 0 : i32
    return %arg0, %c0_i32, %c0_i32_0 : i32, i32, i32
  }
  func.func @transform_4(%arg0: i32, %arg1: i32) -> (i32, i32, i32) {
    %c0_i32 = arith.constant 0 : i32
    %c0_i32_0 = arith.constant 0 : i32
    %c0_i32_1 = arith.constant 0 : i32
    return %arg0, %c0_i32, %c0_i32_0 : i32, i32, i32
  }
  func.func @transform_5(%arg0: i32, %arg1: i32) -> (i32, i32, i32) {
    %c0_i32 = arith.constant 0 : i32
    %c0_i32_0 = arith.constant 0 : i32
    %c0_i32_1 = arith.constant 0 : i32
    return %arg0, %c0_i32, %c0_i32_0 : i32, i32, i32
  }
}

</mosaic_0001>

<bundles_post_ra>
// kernel: dice_loss.1
= control target key start
LH: loop header
LB: loop body
LE: loop exit
PB: predicated region body
PF: predicated region fallthrough
CT: control target
= control target key end

     0   :  { %s609_s18 = smov 0   ;;  %s611_s19 = smov 0   ;;  %s663_s0 = inlined_call_operand.vmem [shape: f32[2,8,128], index: 0, kind: input, shape index: {}]   ;;  %s664_s1 = inlined_call_operand.vmem [shape: f32[2,8,128], index: 1, kind: input, shape index: {}]   ;;  %s665_s2 = inlined_call_operand.vmem [shape: f32[2,8,128], index: 2, kind: input, shape index: {}]   ;;  %s666_s3 = inlined_call_operand.vmem [shape: f32[2,1,1], index: 3, kind: output, shape index: {0}]   ;;  %s667_s4 = inlined_call_operand.vmem [shape: f32[2,1,1], index: 4, kind: output, shape index: {1}]   ;;  %s668_s5 = inlined_call_operand.vmem [shape: f32[2,1,1], index: 5, kind: output, shape index: {2}]  }
   0x1   :  { %s613_s20 = smov 0  }
   0x2 LB: > { %s28_s21 = sadd.s32 1, %s573_s19  ;;  %p520_p0 = scmp.ge.s32.totalorder %s577_s20, 1  ;;  %s577_s20 = sphi %s613_s20, %s16_s20   ;;  %s573_s19 = sphi %s611_s19, %s670_s19   ;;  %s569_s18 = sphi %s609_s18, %s669_s18  }
   0x3   : > { %p30_p1 = scmp.ge.s32.totalorder %s28_s21, 2  ;;  %p236_p2 = scmp.lt.s32.totalorder %s577_s20, 3 }
   0x5   : > { %s672_s21 = smov (%p30_p1, %s28_s21), 0  ;;  %p237_p3 = pnand %p520_p0, %p236_p2 }
   0x6   : > { %p284_p4 = scmp.lt.s32.totalorder (!%p237_p3), %s569_s18, 1  ;;  %vm356_vm0 = vcmask (!%p237_p3), 0  }
   0x7   : > { %240 = sbr.rel (%p237_p3) target bundleno = 209 (0xd1), region = 32 }
   0xe   : > { %s674_s18 = smov (!%p284_p4, %s569_s18), 1 }
   0xf   : > { %s521_s22 = sshll.u32 %s674_s18, 3  ;;  %s313_s9 = scalar_lea.vmem %s668_s5, %s674_s18 }
  0x10   : > { %s297_s25 = scalar_lea.vmem %s664_s1, %s521_s22  ;;  %s304_s28 = scalar_lea.vmem %s665_s2, %s521_s22 }
  0x11   : > { %v328_v0 = vld [vmem:[%s297_s25] sm:$0xff]  ;;  %s290_s6 = scalar_lea.vmem %s663_s0, %s521_s22  ;;  %s307_s12 = scalar_lea.vmem %s666_s3, %s674_s18 }
  0x12   : > { %v329_v1 = vld [vmem:[%s304_s28] sm:$0xff]  ;;  %s310_s15 = scalar_lea.vmem %s667_s4, %s674_s18 }
  0x13   : > { %v331_v2 = vmul.f32 %v329_v1, %v328_v0  ;;  %v321_v3 = vld [vmem:[%s290_s6] sm:$0xff] }
  0x14   : > { %v524_v4 = vmul.f32 -1.442695, %v321_v3 }
  0x15   : > { %v341_v5 = vmul.f32 %v331_v2, %v331_v2 }
  0x16   : > { %551 = vpow2.f32 %v524_v4 }
  0x17   : > { %369 = vadd.xlane.f32.xlu1 %v341_v5 }
  0x20   : > { %v552_v6 = vpop.eup %551 }
  0x21   : > { %v325_v7 = vadd.f32 1.0, %v552_v6 }
  0x23   : > { %553 = vrcp.f32 %v325_v7 }
  0x2d   : > { %v554_v8 = vpop.eup %553 }
  0x2e   : > { %v330_v9 = vmul.f32 %v554_v8, %v329_v1 }
  0x30   : > { %v333_v10 = vmul.f32 %v331_v2, %v330_v9  ;;  %v337_v11 = vmul.f32 %v330_v9, %v330_v9 }
  0x32   : > { %348 = vadd.xlane.f32.xlu0 %v333_v10 }
  0x36   : > { %359 = vadd.xlane.f32.xlu0 %v337_v11 }
  0xa4   : > { %v370_v12 = vpop.xlane.xlu1 %369 }
  0xa5   : > { %v371_v13 = vrot.slane %v370_v12, 4 }
  0xa7   : > { %v372_v14 = vadd.f32 %v371_v13, %v370_v12 }
  0xa9   : > { %v373_v15 = vrot.slane %v372_v14, 2 }
  0xab   : > { %v374_v16 = vadd.f32 %v373_v15, %v372_v14 }
  0xad   : > { %v375_v17 = vrot.slane %v374_v16, 1 }
  0xaf   : > { %v376_v18 = vadd.f32 %v375_v17, %v374_v16 }
  0xb1   : > { %377 = vst.msk [vmem:[%s313_s9] sm:$0x1] %vm356_vm0, %v376_v18 }
  0xbf   : > { %v349_v19 = vpop.xlane.xlu0 %348 }
  0xc0   : > { %v350_v20 = vrot.slane %v349_v19, 4 }
  0xc2   : > { %v351_v21 = vadd.f32 %v350_v20, %v349_v19 }
  0xc3   : > { %v360_v22 = vpop.xlane.xlu0 %359 }
  0xc4   : > { %v352_v23 = vrot.slane %v351_v21, 2  ;;  %v361_v24 = vrot.slane %v360_v22, 4 }
  0xc6   : > { %v353_v25 = vadd.f32 %v352_v23, %v351_v21  ;;  %v362_v26 = vadd.f32 %v361_v24, %v360_v22 }
  0xc8   : > { %v354_v27 = vrot.slane %v353_v25, 1  ;;  %v363_v28 = vrot.slane %v362_v26, 2 }
  0xca   : > { %v355_v29 = vadd.f32 %v354_v27, %v353_v25  ;;  %v364_v30 = vadd.f32 %v363_v28, %v362_v26 }
  0xcc   : > { %357 = vst.msk [vmem:[%s307_s12] sm:$0x1] %vm356_vm0, %v355_v29  ;;  %v365_v31 = vrot.slane %v364_v30, 1 }
  0xce   : > { %v366_v32 = vadd.f32 %v365_v31, %v364_v30 }
  0xd0   : > { %367 = vst.msk [vmem:[%s310_s15] sm:$0x1] %vm356_vm0, %v366_v32 }
  0xd1 PF: > { %s16_s20 = sadd.s32 1, %s577_s20   ;;  %s669_s18 = smov %s573_s19 }
  0xd2   : > { %p13_p5 = scmp.ge.s32.totalorder %s16_s20, 4   ;;  %s670_s19 = smov %s672_s21 }
  0xd4   :  { %15 = sbr.rel (!%p13_p5) target bundleno = 2 (0x2), region = 100 }

</bundles_post_ra>
